<compile_context>
chip_gen: v7x
topology: tpu7x:2x2x1
jax: 0.10.0
libtpu: 0.0.40
codegen_flags: <defaults>
</compile_context>

<pallas_src>
import jax
import jax.numpy as jnp
from jax.experimental import pallas as pl
from jax.experimental.pallas import tpu as pltpu


# -----------------------------------------------------------------------------
# 0) Preferred identity: no kernel at all (no HBM traffic, no pipeline tax).
# -----------------------------------------------------------------------------
def xai_identity(x: jax.Array) -> jax.Array:
    """Identity with zero cost: just hand the buffer back."""
    return x


# -----------------------------------------------------------------------------
# 1) Materialized copy: single HBM->HBM DMA (no VMEM round trip, no grid).
# -----------------------------------------------------------------------------
def _hbm_copy_kernel(x_hbm, o_hbm, sem):
    cp = pltpu.make_async_copy(x_hbm, o_hbm, sem)
    cp.start()
    cp.wait()


def hbm_identity_copy(x: jax.Array) -> jax.Array:
    """Materialize a copy of `x` with one DMA driven entirely off the TensorCore."""
    return pl.pallas_call(
        _hbm_copy_kernel,
        out_shape=jax.ShapeDtypeStruct(x.shape, x.dtype),
        in_specs=[pl.BlockSpec(memory_space=pl.ANY)],
        out_specs=pl.BlockSpec(memory_space=pl.ANY),
        scratch_shapes=[pltpu.SemaphoreType.DMA(())],
        compiler_params=pltpu.CompilerParams(has_side_effects=True),
    )(x)


# -----------------------------------------------------------------------------
# 2) Tiled VMEM-staging template (base for future fused elementwise work).
# -----------------------------------------------------------------------------
def _copy_kernel(x_ref, o_ref):
    # Elementwise pass-through on the current VMEM tile (fuse real work here).
    o_ref[...] = x_ref[...]


def _vmem_capacity_bytes() -> int:
    try:
        return int(pltpu.get_tpu_info().vmem_capacity_bytes)
    except Exception:
        return 64 << 20  # conservative: assume v7x-sized VMEM


def _sublane_multiple(dtype) -> int:
    # 32-bit packs 8 rows / vreg, 16-bit packs 16, 8-bit packs 32.
    return max(8, 32 // jnp.dtype(dtype).itemsize)


def tiled_identity_copy(x: jax.Array) -> jax.Array:
    """Lane-dense, generation-aware tiled HBM->VMEM->HBM copy of any array.

    Kept as a template for fused elementwise kernels; for a pure copy prefer
    `xai_identity` (no-op) or `hbm_identity_copy` (single DMA).
    """
    orig_shape = x.shape
    dtype = x.dtype
    itemsize = jnp.dtype(dtype).itemsize
    sublane = _sublane_multiple(dtype)

    # Generation-aware sizing.
    vmem_bytes = _vmem_capacity_bytes()
    if vmem_bytes >= (100 << 20):                 # v5e / v6e: 128 MiB VMEM
        target_block_bytes = 16 << 20
        vmem_limit_bytes = 96 << 20
        min_grid_steps = 1
    else:                                         # v7x: 64 MiB VMEM, 2 TensorCores
        target_block_bytes = 8 << 20
        vmem_limit_bytes = 48 << 20
        min_grid_steps = 2

    # Robust lane-dense 2-D layout: flatten, pad, cols = large multiple of 128.
    flat = x.reshape(-1)
    n = flat.shape[0]
    cols = 8 * 128                                # 1024-wide rows -> unmasked vst
    row_bytes = cols * itemsize

    rows_needed = pl.cdiv(n, cols)
    rows_aligned = pl.cdiv(rows_needed, sublane) * sublane

    # Largest block (multiple of sublane rows) under the per-block byte target,
    # never larger than the data itself.
    block_rows = max(sublane, (target_block_bytes // row_bytes) // sublane * sublane)
    block_rows = min(block_rows, rows_aligned)

    # On v7x, split into >= 2 parallel steps when there is enough data so both
    # TensorCores get work (a 1-step "parallel" grid cannot shard).
    if min_grid_steps > 1 and rows_aligned >= min_grid_steps * sublane:
        per_step = pl.cdiv(pl.cdiv(rows_aligned, min_grid_steps), sublane) * sublane
        block_rows = min(block_rows, per_step)

    # Pad rows so block_rows divides rows exactly -> every grid step identical
    # (no masked / short final DMA).
    rows = pl.cdiv(rows_aligned, block_rows) * block_rows
    padded_n = rows * cols
    if padded_n != n:
        flat = jnp.pad(flat, (0, padded_n - n))
    x2d = flat.reshape(rows, cols)

    grid = (rows // block_rows,)
    y2d = pl.pallas_call(
        _copy_kernel,
        out_shape=jax.ShapeDtypeStruct((rows, cols), dtype),
        grid=grid,
        in_specs=[pl.BlockSpec((block_rows, cols), lambda i: (i, 0))],
        out_specs=pl.BlockSpec((block_rows, cols), lambda i: (i, 0)),
        compiler_params=pltpu.CompilerParams(
            dimension_semantics=("parallel",),
            vmem_limit_bytes=vmem_limit_bytes,
        ),
    )(x2d)

    return y2d.reshape(-1)[:n].reshape(orig_shape)


# -----------------------------------------------------------------------------
# Module mirror: exact XAIFace semantics.
# -----------------------------------------------------------------------------
class XAIFacePallas:
    """Pallas-side mirror of the PyTorch XAIFace module.

    __init__ creates no parameters (matching the reference), and forward()
    takes no inputs and returns None (matching `pass`).
    """

    def __init__(self):
        pass

    def forward(self):
        return None

    __call__ = forward


if __name__ == "__main__":
    # Exact-semantics check of the module itself: forward() returns None.
    model = XAIFacePallas()
    assert model() is None

    key = jax.random.PRNGKey(0)
    # Small NCHW-shaped input consistent with a vision-module entry point.
    x = jax.random.normal(key, (2, 4, 16, 16), dtype=jnp.float32)

    # (0) Preferred identity path: no copy at all.
    y0 = xai_identity(x)
    assert y0 is x

    # (1) Materialized copy via a single HBM->HBM DMA.
    y1 = jax.block_until_ready(hbm_identity_copy(x))
    assert jnp.array_equal(y1, x)

    # (2) Tiled, lane-dense, generation-aware VMEM-staging template.
    y2 = jax.block_until_ready(tiled_identity_copy(x))
    assert jnp.array_equal(y2, x)

    print("KERNEL_OK")
</pallas_src>

<mosaic_0001>
module attributes {stable_mosaic.version = 11 : i64} {
  func.func @_hbm_copy_kernel(%arg0: memref<2x4x16x16xf32, #tpu.memory_space<any>>, %arg1: memref<2x4x16x16xf32, #tpu.memory_space<any>>, %arg2: memref<!tpu.dma_semaphore, #tpu.memory_space<semaphore_mem>>) attributes {dimension_semantics = [], scalar_prefetch = 0 : i64, scratch_operands = 1 : i64, tpu.core_type = #tpu.core_type<tc>} {
    tpu.enqueue_dma source(%arg0 : memref<2x4x16x16xf32, #tpu.memory_space<any>>) target(%arg1 : memref<2x4x16x16xf32, #tpu.memory_space<any>>) target_semaphore(%arg2 : memref<!tpu.dma_semaphore, #tpu.memory_space<semaphore_mem>>)
    tpu.wait_dma2 semaphore(%arg2 : memref<!tpu.dma_semaphore, #tpu.memory_space<semaphore_mem>>) src(%arg0 : memref<2x4x16x16xf32, #tpu.memory_space<any>>) dst(%arg1 : memref<2x4x16x16xf32, #tpu.memory_space<any>>)
    return
  }
}

</mosaic_0001>

<bundles_post_ra>
// kernel: tpu_custom_call.1
= control target key start
LH: loop header
LB: loop body
LE: loop exit
PB: predicated region body
PF: predicated region fallthrough
CT: control target
= control target key end

     0   :  { %s36_s6 = smov [#allocation2]   ;;  %s37_s7 = smov [#allocation3]   ;;  %s55_s0 = inlined_call_operand.hbm [shape: f32[2,4,16,16], index: 0, kind: input, shape index: {}]   ;;  %s56_s1 = inlined_call_operand.hbm [shape: f32[2,4,16,16], index: 1, kind: output, shape index: {}]  }
   0x1   :  { %s38_s8 = smov 0  }
   0x2   :  { %18 = dma.general %s55_s0, 2048, %s56_s1, %s36_s6, %s37_s7, [#allocation4], %s38_s8, 0  }
   0x3   :  { %34 = dma.done.wait [#allocation2], 2048 }
   0x4   :  { %35 = vsyncadd [#allocation2], 4294965248 }
   0x5   :  { %24 = vsyncmov [#allocation2] }
   0x8   :  { %s25_s13 = vpop.sfrf %24 }
   0x9   :  { %p30_p0 = scmp.ne.s32.totalorder %s25_s13, 0 }
   0xb   :  { %29 = shalt.err (%p30_p0)  }

</bundles_post_ra>
